<compile_context>
chip_gen: v6e
topology: v6e:2x2x1
jax: 0.10.0
libtpu: 0.0.40
codegen_flags: <defaults>
</compile_context>

<pallas_src>
import math
import jax
import jax.numpy as jnp
from jax.experimental import pallas as pl
from jax.experimental.pallas import tpu as pltpu


# ----------------------------- Pallas kernel --------------------------------
def policy_kernel(x_ref, w1_ref, b1_ref, wh_ref, bh_ref, out_ref):
    xt = x_ref[...]                      # (4, TB)   batch on lanes
    w1t = w1_ref[...]                    # (128, 4)

    # Layer 1 as 4 rank-1 VPU updates (K=4 is too small to pay the MXU M-axis
    # cost in the old orientation; here it is cheap VPU filler).
    h = w1t[:, 0:1] * xt[0:1, :] + b1_ref[...]       # (128, TB)
    for k in range(1, 4):                            # static unroll
        h = h + w1t[:, k:k + 1] * xt[k:k + 1, :]
    h = jnp.maximum(h, 0.0)                          # ReLU, (128, TB)

    # Fused heads on the MXU with batch on the N/lane axis:
    #   (3, 128) @ (128, TB) -> (3, TB)
    heads = jnp.dot(wh_ref[...], h, preferred_element_type=jnp.float32)
    heads = heads + bh_ref[...]                      # (3, TB), bias (3, 1)

    # Dense, lane-wide store of all three heads ...
    out_ref[...] = heads

    # ... then overwrite only the sigma row (row 1) with a numerically
    # stable softplus: max(x, 0) + log1p(exp(-|x|)).
    s = heads[1:2, :]                                # (1, TB)
    out_ref[1:2, :] = jnp.maximum(s, 0.0) + jnp.log1p(jnp.exp(-jnp.abs(s)))


# ------------------------------ wrapper --------------------------------------
def _round_up(n, m):
    return ((n + m - 1) // m) * m


def _choose_tile(bp):
    """Lane-axis tile: multiple of 128, <=1024, and >=2 grid steps when
    possible so the parallel axis shards across v7x's two TensorCores."""
    if bp <= 128:
        return bp
    for cand in (1024, 512, 256, 128):
        if bp % cand == 0 and bp // cand >= 2:
            return cand
    return 128


def pack_kernel_params(params):
    """One-time fusion/transposition of the module parameters into the
    kernel's layout (hoisted out of the per-call path)."""
    wh = jnp.concatenate(
        [params["w_mu"], params["w_sigma"], params["w_value"]], axis=1)   # (128,3)
    bh = jnp.concatenate(
        [params["b_mu"], params["b_sigma"], params["b_value"]], axis=1)   # (1,3)
    return {
        "w1_t": jnp.asarray(params["w1"].T),   # (128, 4)
        "b1_t": jnp.asarray(params["b1"].T),   # (128, 1)
        "wh_t": jnp.asarray(wh.T),             # (3, 128)  rows: mu, sigma, value
        "bh_t": jnp.asarray(bh.T),             # (3, 1)
    }


def policy_forward(x, kparams):
    """x: (B, 4) float32; kparams: output of pack_kernel_params.

    Returns (mu, sigma, value), each (B, 1) float32.
    """
    B = x.shape[0]

    # Batch goes on the lane axis -> pad to a multiple of 128 lanes. The pad
    # acts on the tiny transposed (4, B) slab, so its cost is negligible
    # relative to the kernel's own HBM traffic.
    Bp = _round_up(max(B, 1), 128)
    TB = _choose_tile(Bp)

    xt = x.T                                          # (4, B)
    if Bp != B:
        xt = jnp.pad(xt, ((0, 0), (0, Bp - B)))       # (4, Bp)

    out = pl.pallas_call(
        policy_kernel,
        out_shape=jax.ShapeDtypeStruct((3, Bp), jnp.float32),
        grid=(Bp // TB,),
        in_specs=[
            pl.BlockSpec((4, TB), lambda i: (0, i)),      # x tile (pipelined)
            pl.BlockSpec((128, 4), lambda i: (0, 0)),     # W1^T (resident)
            pl.BlockSpec((128, 1), lambda i: (0, 0)),     # b1^T (resident)
            pl.BlockSpec((3, 128), lambda i: (0, 0)),     # fused head W^T
            pl.BlockSpec((3, 1), lambda i: (0, 0)),       # fused head b^T
        ],
        out_specs=pl.BlockSpec((3, TB), lambda i: (0, i)),
        compiler_params=pltpu.CompilerParams(
            dimension_semantics=("parallel",)),            # 2 TCs on v7x
    )(xt, kparams["w1_t"], kparams["b1_t"], kparams["wh_t"], kparams["bh_t"])

    out = out[:, :B]                                   # (3, B)
    mu = out[0].reshape(B, 1)
    sigma = out[1].reshape(B, 1)
    value = out[2].reshape(B, 1)
    return mu, sigma, value


# --------------------------- parameter construction --------------------------
def normalized_columns_init(key, shape_torch, std):
    """shape_torch = (out_features, in_features), matching nn.Linear.weight."""
    out = jax.random.normal(key, shape_torch, dtype=jnp.float32)
    norm = jnp.sqrt(jnp.sum(out * out, axis=1, keepdims=True))
    out = out * (std / norm)
    return out.T  # -> (in_features, out_features) for x @ W layout


def linear_weights_init(key, in_f, out_f):
    """weights_init for Linear: uniform(-w_bound, w_bound), bias = 0."""
    w_bound = math.sqrt(6.0 / (in_f + out_f))
    w = jax.random.uniform(key, (in_f, out_f), dtype=jnp.float32,
                           minval=-w_bound, maxval=w_bound)
    b = jnp.zeros((1, out_f), dtype=jnp.float32)
    return w, b


def make_params(seed=0):
    keys = jax.random.split(jax.random.PRNGKey(seed), 4)
    w1, b1 = linear_weights_init(keys[0], 4, 128)
    # head weights overridden by normalized_columns_initializer, biases = 0
    w_mu = normalized_columns_init(keys[1], (1, 128), 0.01)
    w_sigma = normalized_columns_init(keys[2], (1, 128), 0.01)
    w_value = normalized_columns_init(keys[3], (1, 128), 1.0)
    zeros1 = jnp.zeros((1, 1), dtype=jnp.float32)
    return {
        "w1": w1, "b1": b1,
        "w_mu": w_mu, "b_mu": zeros1,
        "w_sigma": w_sigma, "b_sigma": zeros1,
        "w_value": w_value, "b_value": zeros1,
    }


# -------------------------------- reference ----------------------------------
def policy_ref(x, p):
    h = jax.nn.relu(x @ p["w1"] + p["b1"])
    mu = h @ p["w_mu"] + p["b_mu"]
    sigma = jax.nn.softplus(h @ p["w_sigma"] + p["b_sigma"])
    value = h @ p["w_value"] + p["b_value"]
    return mu, sigma, value


if __name__ == "__main__":
    key = jax.random.PRNGKey(0)
    B = 16
    x = jax.random.normal(key, (B, 4), dtype=jnp.float32)

    params = make_params(seed=0)
    kparams = pack_kernel_params(params)   # fused/transposed once, not per call

    mu, sigma, value = policy_forward(x, kparams)
    jax.block_until_ready((mu, sigma, value))

    mu_r, sigma_r, value_r = policy_ref(x, params)
    assert mu.shape == (B, 1) and sigma.shape == (B, 1) and value.shape == (B, 1)
    assert jnp.allclose(mu, mu_r, atol=1e-5, rtol=1e-5)
    assert jnp.allclose(sigma, sigma_r, atol=1e-5, rtol=1e-5)
    assert jnp.allclose(value, value_r, atol=1e-5, rtol=1e-5)

    print("KERNEL_OK")
</pallas_src>

<mosaic_0001>
module attributes {stable_mosaic.version = 11 : i64} {
  func.func @policy_kernel(%arg0: i32, %arg1: memref<4x128xf32, #tpu.memory_space<vmem>>, %arg2: memref<128x4xf32, #tpu.memory_space<vmem>>, %arg3: memref<128x1xf32, #tpu.memory_space<vmem>>, %arg4: memref<3x128xf32, #tpu.memory_space<vmem>>, %arg5: memref<3x1xf32, #tpu.memory_space<vmem>>, %arg6: memref<3x128xf32, #tpu.memory_space<vmem>>) attributes {dimension_semantics = [#tpu.dimension_semantics<parallel>], iteration_bounds = array<i64: 1>, scalar_prefetch = 0 : i64, scratch_operands = 0 : i64, tpu.core_type = #tpu.core_type<tc>, window_params = [{transform_indices = @transform_0, window_bounds = array<i64: 4, 128>}, {pipeline_mode = #tpu.pipeline_mode<synchronous>, transform_indices = @transform_1, window_bounds = array<i64: 128, 4>}, {pipeline_mode = #tpu.pipeline_mode<synchronous>, transform_indices = @transform_2, window_bounds = array<i64: 128, 1>}, {pipeline_mode = #tpu.pipeline_mode<synchronous>, transform_indices = @transform_3, window_bounds = array<i64: 3, 128>}, {pipeline_mode = #tpu.pipeline_mode<synchronous>, transform_indices = @transform_4, window_bounds = array<i64: 3, 1>}, {transform_indices = @transform_5, window_bounds = array<i64: 3, 128>}]} {
    %c0 = arith.constant 0 : index
    %c0_0 = arith.constant 0 : index
    %0 = vector.load %arg1[%c0, %c0_0] : memref<4x128xf32, #tpu.memory_space<vmem>>, vector<4x128xf32>
    %c0_1 = arith.constant 0 : index
    %c0_2 = arith.constant 0 : index
    %1 = vector.load %arg2[%c0_1, %c0_2] : memref<128x4xf32, #tpu.memory_space<vmem>>, vector<128x4xf32>
    %2 = vector.extract_strided_slice %1 {offsets = [0, 0], sizes = [128, 1], strides = [1, 1]} : vector<128x4xf32> to vector<128x1xf32>
    %3 = vector.extract_strided_slice %0 {offsets = [0, 0], sizes = [1, 128], strides = [1, 1]} : vector<4x128xf32> to vector<1x128xf32>
    %4 = vector.broadcast %2 : vector<128x1xf32> to vector<128x128xf32>
    %5 = vector.broadcast %3 : vector<1x128xf32> to vector<128x128xf32>
    %6 = arith.mulf %4, %5 : vector<128x128xf32>
    %c0_3 = arith.constant 0 : index
    %c0_4 = arith.constant 0 : index
    %7 = vector.load %arg3[%c0_3, %c0_4] : memref<128x1xf32, #tpu.memory_space<vmem>>, vector<128x1xf32>
    %8 = vector.broadcast %7 : vector<128x1xf32> to vector<128x128xf32>
    %9 = arith.addf %6, %8 : vector<128x128xf32>
    %10 = vector.extract_strided_slice %1 {offsets = [0, 1], sizes = [128, 1], strides = [1, 1]} : vector<128x4xf32> to vector<128x1xf32>
    %11 = vector.extract_strided_slice %0 {offsets = [1, 0], sizes = [1, 128], strides = [1, 1]} : vector<4x128xf32> to vector<1x128xf32>
    %12 = vector.broadcast %10 : vector<128x1xf32> to vector<128x128xf32>
    %13 = vector.broadcast %11 : vector<1x128xf32> to vector<128x128xf32>
    %14 = arith.mulf %12, %13 : vector<128x128xf32>
    %15 = arith.addf %9, %14 : vector<128x128xf32>
    %16 = vector.extract_strided_slice %1 {offsets = [0, 2], sizes = [128, 1], strides = [1, 1]} : vector<128x4xf32> to vector<128x1xf32>
    %17 = vector.extract_strided_slice %0 {offsets = [2, 0], sizes = [1, 128], strides = [1, 1]} : vector<4x128xf32> to vector<1x128xf32>
    %18 = vector.broadcast %16 : vector<128x1xf32> to vector<128x128xf32>
    %19 = vector.broadcast %17 : vector<1x128xf32> to vector<128x128xf32>
    %20 = arith.mulf %18, %19 : vector<128x128xf32>
    %21 = arith.addf %15, %20 : vector<128x128xf32>
    %22 = vector.extract_strided_slice %1 {offsets = [0, 3], sizes = [128, 1], strides = [1, 1]} : vector<128x4xf32> to vector<128x1xf32>
    %23 = vector.extract_strided_slice %0 {offsets = [3, 0], sizes = [1, 128], strides = [1, 1]} : vector<4x128xf32> to vector<1x128xf32>
    %24 = vector.broadcast %22 : vector<128x1xf32> to vector<128x128xf32>
    %25 = vector.broadcast %23 : vector<1x128xf32> to vector<128x128xf32>
    %26 = arith.mulf %24, %25 : vector<128x128xf32>
    %27 = arith.addf %21, %26 : vector<128x128xf32>
    %cst = arith.constant 0.000000e+00 : f32
    %28 = vector.broadcast %cst : f32 to vector<128x128xf32>
    %29 = arith.maximumf %27, %28 : vector<128x128xf32>
    %c0_5 = arith.constant 0 : index
    %c0_6 = arith.constant 0 : index
    %30 = vector.load %arg4[%c0_5, %c0_6] : memref<3x128xf32, #tpu.memory_space<vmem>>, vector<3x128xf32>
    %cst_7 = arith.constant dense<0.000000e+00> : vector<3x128xf32>
    %31 = tpu.matmul %30, %29, %cst_7 {dimension_numbers = #tpu.dot_dimension_numbers<[1], [0], [0], [1], [0, 0, 1, 1], [], []>} : vector<3x128xf32>, vector<128x128xf32>, vector<3x128xf32> -> vector<3x128xf32>
    %c0_8 = arith.constant 0 : index
    %c0_9 = arith.constant 0 : index
    %32 = vector.load %arg5[%c0_8, %c0_9] : memref<3x1xf32, #tpu.memory_space<vmem>>, vector<3x1xf32>
    %33 = vector.broadcast %32 : vector<3x1xf32> to vector<3x128xf32>
    %34 = arith.addf %31, %33 : vector<3x128xf32>
    %c0_10 = arith.constant 0 : index
    %c0_11 = arith.constant 0 : index
    %35 = vector.load %arg6[%c0_10, %c0_11] : memref<3x128xf32, #tpu.memory_space<vmem>>, vector<3x128xf32>
    tpu.vector_store %arg6[%c0_10, %c0_11], %34 {strides = array<i32>} : memref<3x128xf32, #tpu.memory_space<vmem>>, vector<3x128xf32>,
    %36 = vector.extract_strided_slice %34 {offsets = [1, 0], sizes = [1, 128], strides = [1, 1]} : vector<3x128xf32> to vector<1x128xf32>
    %cst_12 = arith.constant 0.000000e+00 : f32
    %37 = vector.broadcast %cst_12 : f32 to vector<1x128xf32>
    %38 = arith.maximumf %36, %37 : vector<1x128xf32>
    %39 = math.absf %36 : vector<1x128xf32>
    %cst_13 = arith.constant 0.000000e+00 : f32
    %40 = vector.broadcast %cst_13 : f32 to vector<1x128xf32>
    %41 = arith.subf %40, %39 : vector<1x128xf32>
    %42 = math.exp %41 : vector<1x128xf32>
    %43 = math.log1p %42 : vector<1x128xf32>
    %44 = arith.addf %38, %43 : vector<1x128xf32>
    %c1 = arith.constant 1 : index
    %c0_14 = arith.constant 0 : index
    %45 = vector.load %arg6[%c1, %c0_14] : memref<3x128xf32, #tpu.memory_space<vmem>>, vector<1x128xf32>
    tpu.vector_store %arg6[%c1, %c0_14], %44 {strides = array<i32>} : memref<3x128xf32, #tpu.memory_space<vmem>>, vector<1x128xf32>,
    return
  }
  func.func @transform_0(%arg0: i32) -> (i32, i32) {
    %c0_i32 = arith.constant 0 : i32
    %c0_i32_0 = arith.constant 0 : i32
    return %c0_i32, %arg0 : i32, i32
  }
  func.func @transform_1(%arg0: i32) -> (i32, i32) {
    %c0_i32 = arith.constant 0 : i32
    %c0_i32_0 = arith.constant 0 : i32
    %c0_i32_1 = arith.constant 0 : i32
    return %c0_i32, %c0_i32_0 : i32, i32
  }
  func.func @transform_2(%arg0: i32) -> (i32, i32) {
    %c0_i32 = arith.constant 0 : i32
    %c0_i32_0 = arith.constant 0 : i32
    %c0_i32_1 = arith.constant 0 : i32
    return %c0_i32, %c0_i32_0 : i32, i32
  }
  func.func @transform_3(%arg0: i32) -> (i32, i32) {
    %c0_i32 = arith.constant 0 : i32
    %c0_i32_0 = arith.constant 0 : i32
    %c0_i32_1 = arith.constant 0 : i32
    return %c0_i32, %c0_i32_0 : i32, i32
  }
  func.func @transform_4(%arg0: i32) -> (i32, i32) {
    %c0_i32 = arith.constant 0 : i32
    %c0_i32_0 = arith.constant 0 : i32
    %c0_i32_1 = arith.constant 0 : i32
    return %c0_i32, %c0_i32_0 : i32, i32
  }
  func.func @transform_5(%arg0: i32) -> (i32, i32) {
    %c0_i32 = arith.constant 0 : i32
    %c0_i32_0 = arith.constant 0 : i32
    return %c0_i32, %arg0 : i32, i32
  }
}

</mosaic_0001>

<bundles_post_ra>
// kernel: tpu_custom_call.1
= control target key start
LH: loop header
LB: loop body
LE: loop exit
PB: predicated region body
PF: predicated region fallthrough
CT: control target
= control target key end

     0   :  { %v814_v2 = vmov 3   ;;  %v815_v3 = vmov 0   ;;  %v816_v5 = vmov 1   ;;  %s1214_s0 = inlined_call_operand.vmem [shape: f32[4,128], index: 0, kind: input, shape index: {}]   ;;  %s1215_s1 = inlined_call_operand.vmem [shape: f32[128,4], index: 1, kind: input, shape index: {}]   ;;  %s1216_s2 = inlined_call_operand.vmem [shape: f32[128,1], index: 2, kind: input, shape index: {}]   ;;  %s1217_s3 = inlined_call_operand.vmem [shape: f32[3,128], index: 3, kind: input, shape index: {}]   ;;  %s1218_s4 = inlined_call_operand.vmem [shape: f32[3,1], index: 4, kind: input, shape index: {}]   ;;  %s1219_s5 = inlined_call_operand.hbm [shape: f32[3,128], index: 5, kind: output, shape index: {}]  }
   0x1   :  { %v153_v0 = vld [vmem:[%s1216_s2 + $0x78] sm:$0xff]  ;;  %740 = vset.pattern.permute.xlu0 %v814_v2  ;;  %733 = vset.pattern.permute.xlu1 %v815_v3  ;;  %v862_v4 = vld [vmem:[%s1215_s1 + $0x60] sm:$0xff]  ;;  %v869_v6 = vld [vmem:[%s1215_s1 + $0x48] sm:$0xff] }
   0x2   :  { %v37_v1 = vld [vmem:[%s1215_s1 + $0x78] sm:$0xff]  ;;  %231 = vperm.xlu1 %733, %v153_v0  }
   0x3   :  { %511 = vperm.xlu0 %740, %v37_v1  }
   0x6   :  { %734 = vset.pattern.permute.xlu1 %v816_v5 }
   0x7   :  { %499 = vperm.xlu0 %740, %v862_v4   ;;  %311 = vperm.xlu1 %734, %v37_v1  }
   0x8   :  { %10 = vsyncpa [#allocation3], 0  ;;  %v152_v7 = vld [vmem:[%s1216_s2 + $0x70] sm:$0xff]  ;;  %v817_v9 = vmov 2   ;;  %v35_v11 = vld [vmem:[%s1215_s1 + $0x68] sm:$0xff]  ;;  %v818_v15 = vmov 0.0   ;;  %v118_v42 = vlaneseq }
   0x9   :  { %v879_v8 = vld [vmem:[%s1215_s1 + $0x30] sm:$0xff]  ;;  %v900_v12 = vld [vmem:[%s1215_s1 + $0x18] sm:$0xff]  ;;  %v150_v14 = vld [vmem:[%s1216_s2 + $0x60] sm:$0xff]  ;;  %691 = vmatprep.subr.mxu0 %v818_v15  ;;  %vm819_vm0 = vmmov 0  }
   0xa   :  { %v36_v10 = vld [vmem:[%s1215_s1 + $0x70] sm:$0xff]  ;;  %v33_v13 = vld [vmem:[%s1215_s1 + $0x58] sm:$0xff]  ;;  %v151_v16 = vld [vmem:[%s1216_s2 + $0x68] sm:$0xff]  ;;  %v119_v46 = vshrl.u32 %v118_v42, 7  ;;  %723 = vmatprep.mubr.msk.f32.mxu0 %vm819_vm0, %v818_v15 }
   0xb   :  { %487 = vperm.xlu0 %740, %v869_v6   ;;  %735 = vset.pattern.permute.xlu1 %v815_v3  ;;  %v149_v17 = vld [vmem:[%s1216_s2 + $0x58] sm:$0xff]  ;;  %v32_v18 = vld [vmem:[%s1215_s1 + $0x50] sm:$0xff]  ;;  %v941_v22 = vld [vmem:[%s1215_s1 + $0x20] sm:$0xff] }
   0xc   :  { %226 = vperm.xlu1 %735, %v152_v7   ;;  %v148_v19 = vld [vmem:[%s1216_s2 + $0x50] sm:$0xff]  ;;  %v931_v20 = vld [vmem:[%s1215_s1 + $0x38] sm:$0xff]  ;;  %v142_v23 = vld [vmem:[%s1216_s2 + $0x20] sm:$0xff]  ;;  %v316_v49 = vsub.s32 1, %v119_v46  ;;  %v120_v50 = vsub.s32 0, %v119_v46  ;;  %v516_v52 = vsub.s32 3, %v119_v46 }
   0xd   :  { %v145_v21 = vld [vmem:[%s1216_s2 + $0x38] sm:$0xff]  ;;  %v953_v24 = vld [vmem:[%s1215_s1 + $0x8] sm:$0xff]  ;;  %v30_v26 = vld [vmem:[%s1215_s1 + $0x40] sm:$0xff]  ;;  %v416_v54 = vsub.s32 2, %v119_v46 }
   0xe   :  { %v139_v25 = vld [vmem:[%s1216_s2 + $0x8] sm:$0xff]  ;;  %v146_v28 = vld [vmem:[%s1216_s2 + $0x40] sm:$0xff]  ;;  %v144_v36 = vld [vmem:[%s1216_s2 + $0x30] sm:$0xff] }
   0xf   :  { %475 = vperm.xlu0 %740, %v879_v8   ;;  %v147_v27 = vld [vmem:[%s1216_s2 + $0x48] sm:$0xff]  ;;  %v21_v53 = vld [vmem:[%s1214_s0] sm:$0xf]  ;;  %v141_v42 = vld [vmem:[%s1216_s2 + $0x18] sm:$0xff] }
  0x10   :  { %736 = vset.pattern.permute.xlu1 %v817_v9  ;;  %v995_v33 = vld [vmem:[%s1215_s1 + $0x28] sm:$0xff]  ;;  %v1032_v56 = vrot.slane %v21_v53, %v316_v49  ;;  %v1034_v57 = vrot.slane %v21_v53, %v120_v50  ;;  %v1036_v58 = vrot.slane %v21_v53, %v516_v52  ;;  %v1039_v60 = vrot.slane %v21_v53, %v416_v54 }
  0x11   :  { %411 = vperm.xlu1 %736, %v37_v1   ;;  %v143_v45 = vld [vmem:[%s1216_s2 + $0x28] sm:$0xff] }
  0x13   :  { %768 = vset.pattern.permute.xlu0 %v816_v5 }
  0x14   :  { %307 = vperm.xlu0 %768, %v36_v10  }
  0x15   :  { %737 = vset.pattern.permute.xlu1 %v815_v3 }
  0x16   :  { %100 = vperm.xlu1 %737, %v862_v4  }
  0x18   :  { %299 = vperm.xlu0 %768, %v862_v4  }
  0x1a   :  { %738 = vset.pattern.permute.xlu1 %v816_v5 }
  0x1b   :  { %303 = vperm.xlu1 %738, %v35_v11  }
  0x1c   :  { %287 = vperm.xlu0 %768, %v869_v6  }
  0x1f   :  { %739 = vset.pattern.permute.xlu1 %v817_v9 }
  0x20   :  { %275 = vperm.xlu0 %768, %v879_v8   ;;  %407 = vperm.xlu1 %739, %v36_v10  }
  0x24   :  { %263 = vperm.xlu0 %768, %v900_v12   ;;  %741 = vset.pattern.permute.xlu1 %v815_v3 }
  0x25   :  { %95 = vperm.xlu1 %741, %v33_v13  }
  0x28   :  { %770 = vset.pattern.permute.xlu0 %v815_v3 }
  0x29   :  { %115 = vperm.xlu0 %770, %v37_v1   ;;  %216 = vperm.xlu1 %741, %v150_v14  }
  0x2d   :  { %110 = vperm.xlu0 %770, %v36_v10   ;;  %742 = vset.pattern.permute.xlu1 %v817_v9 }
  0x2e   :  { %403 = vperm.xlu1 %742, %v35_v11  }
  0x31   :  { %105 = vperm.xlu0 %770, %v35_v11  }
  0x32   :  { %743 = vset.pattern.permute.xlu1 %v814_v2 }
  0x33   :  { %507 = vperm.xlu1 %743, %v36_v10  }
  0x35   :  { %221 = vperm.xlu0 %770, %v151_v16  }
  0x37   :  { %744 = vset.pattern.permute.xlu1 %v815_v3 }
  0x38   :  { %211 = vperm.xlu1 %744, %v149_v17  }
  0x39   :  { %90 = vperm.xlu0 %770, %v32_v18  }
  0x3c   :  { %745 = vset.pattern.permute.xlu1 %v816_v5 }
  0x3d   :  { %206 = vperm.xlu0 %770, %v148_v19   ;;  %295 = vperm.xlu1 %745, %v33_v13  }
  0x41   :  { %75 = vperm.xlu0 %770, %v931_v20   ;;  %746 = vset.pattern.permute.xlu1 %v814_v2 }
  0x42   :  { %503 = vperm.xlu1 %746, %v35_v11  }
  0x45   :  { %191 = vperm.xlu0 %770, %v145_v21  }
  0x46   :  { %747 = vset.pattern.permute.xlu1 %v815_v3 }
  0x47   :  { %85 = vperm.xlu1 %747, %v869_v6  }
  0x49   :  { %60 = vperm.xlu0 %770, %v941_v22  }
  0x4b   :  { %748 = vset.pattern.permute.xlu1 %v816_v5 }
  0x4c   :  { %291 = vperm.xlu1 %748, %v32_v18  }
  0x4d   :  { %176 = vperm.xlu0 %770, %v142_v23  }
  0x50   :  { %749 = vset.pattern.permute.xlu1 %v817_v9 }
  0x51   :  { %45 = vperm.xlu0 %770, %v953_v24   ;;  %395 = vperm.xlu1 %749, %v33_v13  }
  0x55   :  { %161 = vperm.xlu0 %770, %v139_v25   ;;  %750 = vset.pattern.permute.xlu1 %v815_v3 }
  0x56   :  { %80 = vperm.xlu1 %750, %v30_v26  }
  0x59   :  { %777 = vset.pattern.permute.xlu0 %v817_v9 }
  0x5a   :  { %399 = vperm.xlu0 %777, %v862_v4   ;;  %201 = vperm.xlu1 %750, %v147_v27  }
  0x5e   :  { %387 = vperm.xlu0 %777, %v869_v6   ;;  %751 = vset.pattern.permute.xlu1 %v817_v9 }
  0x5f   :  { %391 = vperm.xlu1 %751, %v32_v18  }
  0x62   :  { %375 = vperm.xlu0 %777, %v879_v8  }
  0x63   :  { %752 = vset.pattern.permute.xlu1 %v814_v2 }
  0x64   :  { %495 = vperm.xlu1 %752, %v33_v13  }
  0x66   :  { %363 = vperm.xlu0 %777, %v900_v12  }
  0x68   :  { %753 = vset.pattern.permute.xlu1 %v815_v3 }
  0x69   :  { %196 = vperm.xlu1 %753, %v146_v28  }
  0x6a   :  { %355 = vperm.xlu0 %777, %v953_v24  }
  0x6d   :  { %754 = vset.pattern.permute.xlu1 %v816_v5 }
  0x6e   :  { %782 = vset.pattern.permute.xlu0 %v814_v2  ;;  %283 = vperm.xlu1 %754, %v30_v26  }
  0x6f   :  { %463 = vperm.xlu0 %782, %v900_v12  }
  0x72   :  { %755 = vset.pattern.permute.xlu1 %v814_v2 }
  0x73   :  { %455 = vperm.xlu0 %782, %v953_v24   ;;  %491 = vperm.xlu1 %755, %v32_v18  }
  0x77   :  { %787 = vset.pattern.permute.xlu0 %v815_v3  ;;  %756 = vset.pattern.permute.xlu1 %v815_v3 }
  0x78   :  { %70 = vperm.xlu1 %756, %v879_v8  }
  0x7c   :  { %757 = vset.pattern.permute.xlu1 %v816_v5 }
  0x7d   :  { %v232_v29 = vpop.permute.xlu1 %231  ;;  %279 = vperm.xlu1 %757, %v931_v20  }
  0x7e   :  { %v512_v30 = vpop.permute.xlu0 %511 }
  0x7f   :  { %v533_v1 = vmul.f32 %v1036_v58, %v512_v30 }
  0x81   :  { %758 = vset.pattern.permute.xlu1 %v817_v9 }
  0x82   :  { %v990_v31 = vpop.permute.xlu0 %499  ;;  %v312_v32 = vpop.permute.xlu1 %311  ;;  %383 = vperm.xlu1 %758, %v30_v26  }
  0x83   :  { %v333_v63 = vmul.f32 %v1032_v56, %v312_v32  ;;  %v1067_v32 = vld [vmem:[%s1215_s1 + $0x10] sm:$0xff] }
  0x86   :  { %v997_v34 = vpop.permute.xlu0 %487  ;;  %759 = vset.pattern.permute.xlu1 %v815_v3 }
  0x87   :  { %v227_v35 = vpop.permute.xlu1 %226  ;;  %65 = vperm.xlu1 %759, %v995_v33  }
  0x8a   :  { %v1004_v37 = vpop.permute.xlu0 %475 }
  0x8b   :  { %186 = vperm.xlu1 %759, %v144_v36  }
  0x8c   :  { %v412_v38 = vpop.permute.xlu1 %411 }
  0x8d   :  { %v433_v6 = vmul.f32 %v1039_v60, %v412_v38 }
  0x8f   :  { %v308_v39 = vpop.permute.xlu0 %307  ;;  %760 = vset.pattern.permute.xlu1 %v817_v9 }
  0x90   :  { %379 = vperm.xlu1 %760, %v931_v20   ;;  %v332_v7 = vmul.f32 %v1032_v56, %v308_v39 }
  0x91   :  { %v1008_v40 = vpop.permute.xlu1 %100 }
  0x93   :  { %v1010_v41 = vpop.permute.xlu0 %299 }
  0x94   :  { %761 = vset.pattern.permute.xlu1 %v814_v2 }
  0x95   :  { %483 = vperm.xlu1 %761, %v30_v26  }
  0x96   :  { %v1013_v43 = vpop.permute.xlu1 %303 }
  0x97   :  { %v1015_v44 = vpop.permute.xlu0 %287  ;;  %v331_v38 = vmul.f32 %v1032_v56, %v1013_v43 }
  0x99   :  { %762 = vset.pattern.permute.xlu1 %v815_v3 }
  0x9a   :  { %181 = vperm.xlu1 %762, %v143_v45  }
  0x9b   :  { %v1021_v47 = vpop.permute.xlu0 %275  ;;  %v408_v48 = vpop.permute.xlu1 %407 }
  0x9c   :  { %v432_v17 = vmul.f32 %v1039_v60, %v408_v48 }
  0x9e   :  { %763 = vset.pattern.permute.xlu1 %v816_v5 }
  0x9f   :  { %v1024_v51 = vpop.permute.xlu0 %263  ;;  %271 = vperm.xlu1 %763, %v995_v33  }
  0xa0   :  { %v1030_v55 = vpop.permute.xlu1 %95 }
  0xa3   :  { %764 = vset.pattern.permute.xlu1 %v814_v2 }
  0xa4   :  { %v116_v59 = vpop.permute.xlu0 %115  ;;  %v1042_v62 = vpop.permute.xlu1 %216  ;;  %479 = vperm.xlu1 %764, %v931_v20  }
  0xa5   :  { %v137_v61 = vmul.f32 %v1034_v57, %v116_v59 }
  0xa7   :  { %v249_v0 = vadd.f32 %v232_v29, %v137_v61 }
  0xa8   :  { %v111_v4 = vpop.permute.xlu0 %110  ;;  %765 = vset.pattern.permute.xlu1 %v815_v3 }
  0xa9   :  { %v349_v8 = vadd.f32 %v333_v63, %v249_v0  ;;  %v136_v10 = vmul.f32 %v1034_v57, %v111_v4  ;;  %v404_v11 = vpop.permute.xlu1 %403  ;;  %55 = vperm.xlu1 %765, %v900_v12  }
  0xaa   :  { %v431_v48 = vmul.f32 %v1039_v60, %v404_v11 }
  0xab   :  { %v248_v13 = vadd.f32 %v227_v35, %v136_v10  ;;  %v449_v14 = vadd.f32 %v433_v6, %v349_v8  ;;  %v140_v8 = vld [vmem:[%s1216_s2 + $0x10] sm:$0xff] }
  0xac   :  { %v106_v16 = vpop.permute.xlu0 %105 }
  0xad   :  { %v348_v18 = vadd.f32 %v332_v7, %v248_v13  ;;  %v549_v19 = vadd.f32 %v533_v1, %v449_v14  ;;  %766 = vset.pattern.permute.xlu1 %v816_v5  ;;  %v135_v12 = vmul.f32 %v1034_v57, %v106_v16  ;;  %v134_v14 = vmul.f32 %v1034_v57, %v1008_v40 }
  0xae   :  { %v508_v20 = vpop.permute.xlu1 %507  ;;  %267 = vperm.xlu1 %766, %v941_v22  }
  0xaf   :  { %v448_v21 = vadd.f32 %v432_v17, %v348_v18  ;;  %v565_v23 = vmax.f32 %v549_v19, 0.0  ;;  %v532_v25 = vmul.f32 %v1036_v58, %v508_v20  ;;  %v330_v17 = vmul.f32 %v1032_v56, %v1010_v41 }
  0xb0   :  { %v222_v26 = vpop.permute.xlu0 %221  ;;  %v246_v18 = vadd.f32 %v1042_v62, %v134_v14  ;;  %v327_v20 = vmul.f32 %v1032_v56, %v1015_v44  ;;  %v22_v44 = vld [vmem:[%s1215_s1] sm:$0xff] }
  0xb1   :  { %692 = vmatpush3.msra.mxu0 %v565_v23  ;;  %v548_v27 = vadd.f32 %v532_v25, %v448_v21  ;;  %v247_v35 = vadd.f32 %v222_v26, %v135_v12  ;;  %v530_v23 = vmul.f32 %v1036_v58, %v990_v31 }
  0xb2   :  { %693 = vmatprep.subr.mxu0 %v818_v15  ;;  %767 = vset.pattern.permute.xlu1 %v817_v9  ;;  %v346_v25 = vadd.f32 %v330_v17, %v246_v18  ;;  %v324_v18 = vmul.f32 %v1032_v56, %v1021_v47 }
  0xb3   :  { %v564_v28 = vmax.f32 %v548_v27, 0.0  ;;  %v1059_v29 = vpop.permute.xlu1 %211  ;;  %371 = vperm.xlu1 %767, %v995_v33   ;;  %v347_v45 = vadd.f32 %v331_v38, %v247_v35  ;;  %v527_v35 = vmul.f32 %v1036_v58, %v997_v34 }
  0xb4   :  { %v1062_v30 = vpop.permute.xlu0 %90 }
  0xb5   :  { %694 = vmatpush3.msra.mxu0 %v564_v28  ;;  %v447_v52 = vadd.f32 %v431_v48, %v347_v45 }
  0xb6   :  { %695 = vmatprep.subr.mxu0 %v818_v15 }
  0xb7   :  { %769 = vset.pattern.permute.xlu1 %v815_v3 }
  0xb8   :  { %v1071_v36 = vpop.permute.xlu0 %206  ;;  %v296_v39 = vpop.permute.xlu1 %295  ;;  %50 = vperm.xlu1 %769, %v1067_v32  }
  0xbc   :  { %v76_v46 = vpop.permute.xlu0 %75  ;;  %171 = vperm.xlu1 %769, %v141_v42   ;;  %v133_v42 = vmul.f32 %v1034_v57, %v1030_v55 }
  0xbd   :  { %v129_v49 = vmul.f32 %v1034_v57, %v76_v46  ;;  %v504_v50 = vpop.permute.xlu1 %503 }
  0xbe   :  { %v531_v53 = vmul.f32 %v1036_v58, %v504_v50 }
  0xc0   :  { %v192_v54 = vpop.permute.xlu0 %191  ;;  %v547_v43 = vadd.f32 %v531_v53, %v447_v52  ;;  %771 = vset.pattern.permute.xlu1 %v817_v9 }
  0xc1   :  { %v1082_v59 = vadd.f32 %v192_v54, %v129_v49  ;;  %367 = vperm.xlu1 %771, %v941_v22   ;;  %v245_v49 = vadd.f32 %v1059_v29, %v133_v42 }
  0xc2   :  { %v563_v61 = vmax.f32 %v547_v43, 0.0  ;;  %v86_v63 = vpop.permute.xlu1 %85 }
  0xc3   :  { %v131_v21 = vmul.f32 %v1034_v57, %v86_v63  ;;  %v138_v63 = vld [vmem:[%s1216_s2] sm:$0xff] }
  0xc4   :  { %v61_v0 = vpop.permute.xlu0 %60  ;;  %696 = vmatpush3.msra.mxu0 %v563_v61  ;;  %v132_v61 = vmul.f32 %v1034_v57, %v1062_v30 }
  0xc5   :  { %v126_v1 = vmul.f32 %v1034_v57, %v61_v0  ;;  %772 = vset.pattern.permute.xlu1 %v814_v2  ;;  %697 = vmatprep.subr.mxu0 %v818_v15 }
  0xc6   :  { %471 = vperm.xlu1 %772, %v995_v33  }
  0xc7   :  { %v1090_v4 = vpop.permute.xlu1 %291 }
  0xc8   :  { %v177_v6 = vpop.permute.xlu0 %176  ;;  %v328_v0 = vmul.f32 %v1032_v56, %v1090_v4 }
  0xc9   :  { %v1092_v7 = vadd.f32 %v177_v6, %v126_v1 }
  0xca   :  { %773 = vset.pattern.permute.xlu1 %v815_v3 }
  0xcb   :  { %166 = vperm.xlu1 %773, %v140_v8  }
  0xcc   :  { %v46_v10 = vpop.permute.xlu0 %45  ;;  %v396_v11 = vpop.permute.xlu1 %395 }
  0xcd   :  { %v123_v13 = vmul.f32 %v1034_v57, %v46_v10  ;;  %v429_v50 = vmul.f32 %v1039_v60, %v396_v11 }
  0xcf   :  { %774 = vset.pattern.permute.xlu1 %v816_v5 }
  0xd0   :  { %v162_v33 = vpop.permute.xlu0 %161  ;;  %259 = vperm.xlu1 %774, %v1067_v32  }
  0xd1   :  { %v1103_v16 = vadd.f32 %v162_v33, %v123_v13  ;;  %v1108_v19 = vpop.permute.xlu1 %80 }
  0xd4   :  { %775 = vset.pattern.permute.xlu1 %v814_v2 }
  0xd5   :  { %v400_v40 = vpop.permute.xlu0 %399  ;;  %v202_v27 = vpop.permute.xlu1 %201  ;;  %467 = vperm.xlu1 %775, %v941_v22   ;;  %v329_v22 = vmul.f32 %v1032_v56, %v296_v39 }
  0xd6   :  { %v430_v26 = vmul.f32 %v1039_v60, %v400_v40  ;;  %v243_v41 = vadd.f32 %v202_v27, %v131_v21 }
  0xd7   :  { %v345_v52 = vadd.f32 %v329_v22, %v245_v49 }
  0xd8   :  { %v446_v62 = vadd.f32 %v430_v26, %v346_v25  ;;  %v343_v12 = vadd.f32 %v327_v20, %v243_v41  ;;  %v524_v25 = vmul.f32 %v1036_v58, %v1004_v37  ;;  %v130_v26 = vmul.f32 %v1034_v57, %v1108_v19 }
  0xd9   :  { %v388_v28 = vpop.permute.xlu0 %387  ;;  %776 = vset.pattern.permute.xlu1 %v815_v3  ;;  %v445_v55 = vadd.f32 %v429_v50, %v345_v52 }
  0xda   :  { %v427_v38 = vmul.f32 %v1039_v60, %v388_v28  ;;  %v546_v31 = vadd.f32 %v530_v23, %v446_v62  ;;  %v392_v45 = vpop.permute.xlu1 %391  ;;  %40 = vperm.xlu1 %776, %v22_v44  }
  0xdb   :  { %v428_v6 = vmul.f32 %v1039_v60, %v392_v45 }
  0xdc   :  { %v443_v46 = vadd.f32 %v427_v38, %v343_v12  ;;  %v562_v48 = vmax.f32 %v546_v31, 0.0 }
  0xde   :  { %698 = vmatpush3.msra.mxu0 %v562_v48  ;;  %v543_v34 = vadd.f32 %v527_v35, %v443_v46  ;;  %778 = vset.pattern.permute.xlu1 %v816_v5 }
  0xdf   :  { %699 = vmatprep.subr.mxu0 %v818_v15  ;;  %v496_v53 = vpop.permute.xlu1 %495  ;;  %255 = vperm.xlu1 %778, %v953_v24   ;;  %v244_v24 = vadd.f32 %v1071_v36, %v132_v61 }
  0xe0   :  { %v529_v39 = vmul.f32 %v1036_v58, %v496_v53  ;;  %v559_v4 = vmax.f32 %v543_v34, 0.0 }
  0xe1   :  { %v344_v8 = vadd.f32 %v328_v0, %v244_v24 }
  0xe2   :  { %v545_v54 = vadd.f32 %v529_v39, %v445_v55 }
  0xe3   :  { %779 = vset.pattern.permute.xlu1 %v817_v9  ;;  %v444_v10 = vadd.f32 %v428_v6, %v344_v8 }
  0xe4   :  { %v561_v43 = vmax.f32 %v545_v54, 0.0  ;;  %v197_v29 = vpop.permute.xlu1 %196  ;;  %359 = vperm.xlu1 %779, %v1067_v32  }
  0xe5   :  { %v242_v62 = vadd.f32 %v197_v29, %v130_v26 }
  0xe6   :  { %700 = vmatpush3.msra.mxu0 %v561_v43 }
  0xe7   :  { %701 = vmatprep.subr.mxu0 %v818_v15 }
  0xe8   :  { %780 = vset.pattern.permute.xlu1 %v815_v3 }
  0xe9   :  { %v284_v1 = vpop.permute.xlu1 %283  ;;  %156 = vperm.xlu1 %780, %v138_v63  }
  0xed   :  { %781 = vset.pattern.permute.xlu1 %v816_v5 }
  0xee   :  { %v492_v30 = vpop.permute.xlu1 %491  ;;  %251 = vperm.xlu1 %781, %v22_v44  }
  0xef   :  { %v528_v11 = vmul.f32 %v1036_v58, %v492_v30 }
  0xf1   :  { %v544_v13 = vadd.f32 %v528_v11, %v444_v10 }
  0xf2   :  { %783 = vset.pattern.permute.xlu1 %v814_v2 }
  0xf3   :  { %v560_v14 = vmax.f32 %v544_v13, 0.0  ;;  %v71_v36 = vpop.permute.xlu1 %70  ;;  %459 = vperm.xlu1 %783, %v1067_v32   ;;  %v567_v32 = vld [vmem:[%s1218_s4] sm:$0x7] }
  0xf4   :  { %v128_v20 = vmul.f32 %v1034_v57, %v71_v36 }
  0xf5   :  { %702 = vmatpush3.msra.mxu0 %v560_v14 }
  0xf6   :  { %703 = vmatprep.subr.mxu0 %v818_v15 }
  0xf7   :  { %784 = vset.pattern.permute.xlu1 %v817_v9  ;;  %704 = vmatpush3.msra.mxu0 %v559_v4  ;;  %v376_v9 = vpop.permute.xlu0 %375 }
  0xf8   :  { %v280_v5 = vpop.permute.xlu1 %279  ;;  %351 = vperm.xlu1 %784, %v22_v44   ;;  %705 = vmatprep.subr.mxu0 %v818_v15  ;;  %v424_v40 = vmul.f32 %v1039_v60, %v376_v9 }
  0xf9   :  { %v325_v37 = vmul.f32 %v1032_v56, %v280_v5 }
  0xfb   :  { %v341_v46 = vadd.f32 %v325_v37, %v1082_v59  ;;  %v364_v6 = vpop.permute.xlu0 %363 }
  0xfc   :  { %785 = vset.pattern.permute.xlu1 %v814_v2 }
  0xfd   :  { %v384_v33 = vpop.permute.xlu1 %383  ;;  %451 = vperm.xlu1 %785, %v22_v44  }
  0xfe   :  { %v426_v47 = vmul.f32 %v1039_v60, %v384_v33  ;;  %v321_v33 = vmul.f32 %v1032_v56, %v1024_v51 }
  0xff   :  { %v356_v14 = vpop.permute.xlu0 %355 }
 0x101   :  { %786 = vset.pattern.permute.xlu1 %v815_v3  ;;  %v326_v3 = vmul.f32 %v1032_v56, %v284_v1 }
 0x102   :  { %v66_v17 = vpop.permute.xlu1 %65  ;;  %570 = vperm.xlu1 %786, %v567_v32  }
 0x103   :  { %v342_v12 = vadd.f32 %v326_v3, %v242_v62  ;;  %v127_v59 = vmul.f32 %v1034_v57, %v66_v17  ;;  %v421_v17 = vmul.f32 %v1039_v60, %v364_v6 }
 0x105   :  { %v442_v35 = vadd.f32 %v426_v47, %v342_v12 }
 0x106   :  { %v187_v2 = vpop.permute.xlu1 %186 }
 0x107   :  { %v240_v21 = vadd.f32 %v187_v2, %v128_v20  ;;  %v464_v20 = vpop.permute.xlu0 %463 }
 0x109   :  { %v340_v23 = vadd.f32 %v324_v18, %v240_v21 }
 0x10b   :  { %v440_v27 = vadd.f32 %v424_v40, %v340_v23  ;;  %v380_v41 = vpop.permute.xlu1 %379  ;;  %v521_v23 = vmul.f32 %v1036_v58, %v464_v20  ;;  %v456_v37 = vpop.permute.xlu0 %455 }
 0x10c   :  { %v425_v45 = vmul.f32 %v1039_v60, %v380_v41 }
 0x10d   :  { %v540_v44 = vadd.f32 %v524_v25, %v440_v27 }
 0x10e   :  { %v441_v49 = vadd.f32 %v425_v45, %v341_v46 }
 0x10f   :  { %v556_v55 = vmax.f32 %v540_v44, 0.0 }
 0x110   :  { %v484_v28 = vpop.permute.xlu1 %483 }
 0x111   :  { %v526_v38 = vmul.f32 %v1036_v58, %v484_v28 }
 0x113   :  { %v542_v31 = vadd.f32 %v526_v38, %v442_v35  ;;  %v419_v38 = vmul.f32 %v1039_v60, %v356_v14 }
 0x115   :  { %v558_v42 = vmax.f32 %v542_v31, 0.0  ;;  %v182_v22 = vpop.permute.xlu1 %181 }
 0x116   :  { %v239_v24 = vadd.f32 %v182_v22, %v127_v59 }
 0x117   :  { %706 = vmatpush3.msra.mxu0 %v558_v42 }
 0x118   :  { %707 = vmatprep.subr.mxu0 %v818_v15 }
 0x11a   :  { %v272_v19 = vpop.permute.xlu1 %271 }
 0x11b   :  { %v323_v61 = vmul.f32 %v1032_v56, %v272_v19 }
 0x11d   :  { %v339_v1 = vadd.f32 %v323_v61, %v239_v24 }
 0x11f   :  { %v480_v48 = vpop.permute.xlu1 %479 }
 0x120   :  { %v525_v50 = vmul.f32 %v1036_v58, %v480_v48 }
 0x122   :  { %v541_v34 = vadd.f32 %v525_v50, %v441_v49  ;;  %v519_v49 = vmul.f32 %v1036_v58, %v456_v37 }
 0x124   :  { %v557_v52 = vmax.f32 %v541_v34, 0.0  ;;  %v56_v53 = vpop.permute.xlu1 %55 }
 0x125   :  { %v125_v13 = vmul.f32 %v1034_v57, %v56_v53 }
 0x126   :  { %708 = vmatpush3.msra.mxu0 %v557_v52 }
 0x127   :  { %709 = vmatprep.subr.mxu0 %v818_v15 }
 0x128   :  { %710 = vmatpush3.msra.mxu0 %v556_v55 }
 0x129   :  { %v268_v39 = vpop.permute.xlu1 %267  ;;  %711 = vmatprep.subr.mxu0 %v818_v15 }
 0x12a   :  { %v322_v32 = vmul.f32 %v1032_v56, %v268_v39 }
 0x12c   :  { %v338_v21 = vadd.f32 %v322_v32, %v1092_v7 }
 0x12e   :  { %v372_v54 = vpop.permute.xlu1 %371 }
 0x12f   :  { %v423_v0 = vmul.f32 %v1039_v60, %v372_v54 }
 0x131   :  { %v439_v30 = vadd.f32 %v423_v0, %v339_v1 }
 0x133   :  { %v51_v43 = vpop.permute.xlu1 %50 }
 0x134   :  { %v124_v35 = vmul.f32 %v1034_v57, %v51_v43 }
 0x137   :  { %v172_v29 = vpop.permute.xlu1 %171 }
 0x138   :  { %v237_v5 = vadd.f32 %v172_v29, %v125_v13 }
 0x13a   :  { %v337_v9 = vadd.f32 %v321_v33, %v237_v5 }
 0x13c   :  { %v368_v63 = vpop.permute.xlu1 %367  ;;  %v437_v40 = vadd.f32 %v421_v17, %v337_v9 }
 0x13d   :  { %v422_v2 = vmul.f32 %v1039_v60, %v368_v63 }
 0x13e   :  { %v537_v3 = vadd.f32 %v521_v23, %v437_v40 }
 0x13f   :  { %v438_v26 = vadd.f32 %v422_v2, %v338_v21 }
 0x140   :  { %v553_v47 = vmax.f32 %v537_v3, 0.0 }
 0x141   :  { %v472_v8 = vpop.permute.xlu1 %471 }
 0x142   :  { %v523_v10 = vmul.f32 %v1036_v58, %v472_v8 }
 0x144   :  { %v539_v11 = vadd.f32 %v523_v10, %v439_v30 }
 0x146   :  { %v555_v36 = vmax.f32 %v539_v11, 0.0  ;;  %v167_v4 = vpop.permute.xlu1 %166 }
 0x147   :  { %v236_v19 = vadd.f32 %v167_v4, %v124_v35 }
 0x148   :  { %712 = vmatpush3.msra.mxu0 %v555_v36 }
 0x149   :  { %713 = vmatprep.subr.mxu0 %v818_v15 }
 0x14b   :  { %v260_v18 = vpop.permute.xlu1 %259 }
 0x14c   :  { %v320_v31 = vmul.f32 %v1032_v56, %v260_v18 }
 0x14e   :  { %v336_v46 = vadd.f32 %v320_v31, %v236_v19 }
 0x150   :  { %v468_v25 = vpop.permute.xlu1 %467 }
 0x151   :  { %v522_v51 = vmul.f32 %v1036_v58, %v468_v25 }
 0x153   :  { %v538_v27 = vadd.f32 %v522_v51, %v438_v26 }
 0x155   :  { %v554_v41 = vmax.f32 %v538_v27, 0.0  ;;  %v41_v62 = vpop.permute.xlu1 %40 }
 0x156   :  { %v122_v39 = vmul.f32 %v1034_v57, %v41_v62 }
 0x157   :  { %714 = vmatpush3.msra.mxu0 %v554_v41 }
 0x158   :  { %715 = vmatprep.subr.mxu0 %v818_v15 }
 0x159   :  { %716 = vmatpush3.msra.mxu0 %v553_v47 }
 0x15a   :  { %v256_v44 = vpop.permute.xlu1 %255  ;;  %717 = vmatprep.subr.mxu0 %v818_v15 }
 0x15b   :  { %v319_v28 = vmul.f32 %v1032_v56, %v256_v44 }
 0x15d   :  { %v335_v42 = vadd.f32 %v319_v28, %v1103_v16 }
 0x15f   :  { %v360_v7 = vpop.permute.xlu1 %359  ;;  %v435_v48 = vadd.f32 %v419_v38, %v335_v42 }
 0x160   :  { %v420_v45 = vmul.f32 %v1039_v60, %v360_v7 }
 0x161   :  { %v535_v53 = vadd.f32 %v519_v49, %v435_v48 }
 0x162   :  { %v436_v34 = vadd.f32 %v420_v45, %v336_v46 }
 0x163   :  { %v551_v29 = vmax.f32 %v535_v53, 0.0 }
 0x164   :  { %v157_v12 = vpop.permute.xlu1 %156 }
 0x165   :  { %v234_v59 = vadd.f32 %v157_v12, %v122_v39 }
 0x169   :  { %v252_v22 = vpop.permute.xlu1 %251 }
 0x16a   :  { %v318_v54 = vmul.f32 %v1032_v56, %v252_v22  ;;  %v566_v56 = vld [vmem:[%s1217_s3] sm:$0x7]  ;;  %s820_s3 = smov [#allocation2]  }
 0x16b   :  { %s666_s9 = sshll.u32 %s820_s3, 4  ;;  %s667_s9 = int_to_ptr.vmem [resolvable:$true] %s666_s9 }
 0x16c   :  { %v334_v63 = vadd.f32 %v318_v54, %v234_v59  ;;  %s792_s10 = scalar_lea.vmem %s667_s9, 64  ;;  %p797_p1 = scmp.lt.s32.totalorder %s667_s9, %s667_s9 }
 0x16d   :  { %p793_p0 = scmp.ne.s32.totalorder %s667_s9, %s792_s10  ;;  %p798_p2 = scmp.lt.s32.totalorder %s792_s10, %s792_s10 }
 0x16e   :  { %v460_v50 = vpop.permute.xlu1 %459 }
 0x16f   :  { %v520_v52 = vmul.f32 %v1036_v58, %v460_v50  ;;  %p799_p3 = por %p798_p2, %p797_p1 }
 0x171   :  { %v536_v55 = vadd.f32 %v520_v52, %v436_v34  ;;  %p800_p4 = pnand %p799_p3, %p793_p0 }
 0x173   :  { %v552_v16 = vmax.f32 %v536_v55, 0.0  ;;  %v352_v43 = vpop.permute.xlu1 %351 }
 0x174   :  { %v418_v61 = vmul.f32 %v1039_v60, %v352_v43 }
 0x175   :  { %718 = vmatpush3.msra.mxu0 %v552_v16 }
 0x176   :  { %719 = vmatprep.subr.mxu0 %v818_v15  ;;  %v434_v0 = vadd.f32 %v418_v61, %v334_v63 }
 0x177   :  { %720 = vmatpush3.msra.mxu0 %v551_v29 }
 0x178   :  { %v452_v24 = vpop.permute.xlu1 %451  ;;  %721 = vmatprep.subr.mxu0 %v818_v15 }
 0x179   :  { %v518_v1 = vmul.f32 %v1036_v58, %v452_v24 }
 0x17b   :  { %v534_v57 = vadd.f32 %v518_v1, %v434_v0 }
 0x17d   :  { %v550_v6 = vmax.f32 %v534_v57, 0.0  ;;  %v571_v60 = vpop.permute.xlu1 %570 }
 0x17f   :  { %722 = vmatpush3.msra.mxu0 %v550_v6 }
 0x180   :  { %724 = vmatmul.mubr.f32.vlgmr.msra.gmra.mxu0 %v566_v56 }
 0x240   :  { %v639_v8 = vpop.f32.mrf.mxu0 }
 0x241   :  { %v640_v30 = vadd.f32 %v639_v8, %v571_v60 }
 0x242   :  { %v725_v10 = vpop.f32.mrf.mxu0 }
 0x243   :  { %v645_v11 = vand.u32 2147483647, %v640_v30  ;;  %643 = vst [vmem:[#allocation2] sm:$0x7] %v640_v30  ;;  %v644_v9 = vmax.f32 %v640_v30, 0.0 }
 0x245   :  { %v646_v13 = vsub.f32 0.0, %v645_v11 }
 0x247   :  { %v647_v14 = vmul.f32 1.442695, %v646_v13 }
 0x249   :  { %788 = vpow2.f32 %v647_v14 }
 0x256   :  { %v789_v15 = vpop.eup %788 }
 0x257   :  { %v649_v36 = vadd.f32 1.0, %v789_v15  ;;  %v652_v58 = vmul.f32 -0.5, %v789_v15  ;;  %v655_v5 = vand.u32 2147483647, %v789_v15 }
 0x259   :  { %790 = vlog2.f32 %v649_v36  ;;  %v653_v4 = vadd.f32 1.0, %v652_v58  ;;  %vm656_vm1 = vcmp.lt.f32.partialorder %v655_v5, 0.0004427343 }
 0x25b   :  { %v654_v17 = vmul.f32 %v789_v15, %v653_v4 }
 0x266   :  { %v791_v33 = vpop.eup %790 }
 0x267   :  { %v651_v32 = vmul.f32 0.6931472, %v791_v33 }
 0x269   :  { %v657_v18 = vsel %vm656_vm1, %v654_v17, %v651_v32 }
 0x26a   :  { %v658_v20 = vadd.f32 %v657_v18, %v644_v9 }
 0x26c   :  { %659 = vst [vmem:[#allocation2] sm:$0x2] %v658_v20 }
 0x26d   :  { %803 = shalt.err (!%p800_p4)
}
 0x26e   :  { %669 = dma.vmem_to_hbm [thread:$0]  %s667_s9, 64, %s1219_s5, [#allocation3]  }
 0x26f   :  { %812 = dma.done.wait [#allocation3], 64  }
 0x270   :  { %813 = vsyncadd [#allocation3], 4294967232 }
 0x271   :  { %673 = vsyncpa [#allocation3], 1 }

</bundles_post_ra>
